<compile_context>
chip_gen: v5e
topology: v5e:2x2
jax: 0.10.0
libtpu: 0.0.40
codegen_flags: <defaults>
</compile_context>

<pallas_src>
import functools

import jax
import jax.numpy as jnp
from jax.experimental import pallas as pl
from jax.experimental.pallas import tpu as pltpu


def _policy_mlp_kernel(x_ref, w1_ref, b1_ref, w2_ref, b2_ref, w3_ref, b3_ref,
                       o_ref):
    """Fused 3-layer MLP: relu(relu(x@W1+b1)@W2+b2)@W3+b3 (f32 accumulation)."""
    # Cast the streamed batch tile in-kernel (no-op when compute dtype is f32);
    # avoids a separate wrapper-side XLA cast pass over the whole batch.
    x = x_ref[...].astype(w1_ref.dtype)
    h1 = jnp.dot(x, w1_ref[...], preferred_element_type=jnp.float32) + b1_ref[...]
    h1 = jnp.maximum(h1, 0.0).astype(w2_ref.dtype)
    h2 = jnp.dot(h1, w2_ref[...], preferred_element_type=jnp.float32) + b2_ref[...]
    h2 = jnp.maximum(h2, 0.0).astype(w3_ref.dtype)
    logits = jnp.dot(h2, w3_ref[...], preferred_element_type=jnp.float32) + b3_ref[...]
    o_ref[...] = logits.astype(o_ref.dtype)


def _round_up(x, m):
    return ((x + m - 1) // m) * m


@functools.partial(jax.jit,
                   static_argnames=("batch_tile", "compute_dtype", "num_cores"))
def policy_network_forward(states, params, *, batch_tile=1024,
                           compute_dtype=jnp.float32, num_cores=1):
    """Run the GAIL PolicyNetwork forward pass with a Pallas TPU kernel.

    Args:
      states: [B, state_dim] float32.
      params: dict with w1[state_dim,H], b1[1,H], w2[H,H], b2[1,H],
              w3[H,action_dim], b3[1,action_dim] (all float32).
      batch_tile: batch rows per grid step. 1024 (default) to 2048 is a good
        choice on all generations — the kernel is HBM-bound and larger tiles
        amortize the ~0.35 us per-step overhead; VMEM stays at a few MiB.
      compute_dtype: matmul input dtype. jnp.bfloat16 halves input HBM bytes
        and matches the bf16-native MXU on v5e/v6e/v7x; accumulation is f32.
      num_cores: TensorCores per chip (1 for v5e/v6e, 2 for v7x).  When > 1
        and B is large enough, the batch is split into >= num_cores balanced
        grid steps so the "parallel" axis can shard across cores.
    Returns:
      [B, action_dim] float32 action logits.
    """
    w1, b1 = params["w1"], params["b1"]
    w2, b2 = params["w2"], params["b2"]
    w3, b3 = params["w3"], params["b3"]

    B, state_dim = states.shape
    hidden_dim = w1.shape[1]
    action_dim = w3.shape[1]

    cdt = jnp.dtype(compute_dtype)
    # Weight/bias casts are one-shot and tiny; keep them in the wrapper.
    # The (large, streamed) states are cast inside the kernel instead.
    w1, w2, w3 = (w.astype(cdt) for w in (w1, w2, w3))
    b1, b2, b3 = (b.astype(jnp.float32) for b in (b1, b2, b3))

    # Batch tiling: multiple of 8 (sublane), capped at B (rounded up to 8).
    tb = min(max(8, _round_up(batch_tile, 8)), _round_up(B, 8))
    n_steps = pl.cdiv(B, tb)
    # Generation-aware split: only force extra grid steps when there is a
    # second TensorCore to feed (v7x), and keep the per-core tiles balanced.
    if num_cores > 1 and n_steps < num_cores and B > 8 * num_cores:
        tb = max(8, _round_up(pl.cdiv(B, num_cores), 8))
        n_steps = pl.cdiv(B, tb)
    grid = (n_steps,)

    bytes_per = lambda a: a.size * a.dtype.itemsize
    cost = pl.CostEstimate(
        flops=2 * B * (state_dim * hidden_dim
                       + hidden_dim * hidden_dim
                       + hidden_dim * action_dim),
        transcendentals=0,
        bytes_accessed=(bytes_per(states)
                        + sum(bytes_per(a) for a in (w1, b1, w2, b2, w3, b3))
                        + B * action_dim * 4),
    )

    out = pl.pallas_call(
        _policy_mlp_kernel,
        out_shape=jax.ShapeDtypeStruct((B, action_dim), jnp.float32),
        grid=grid,
        in_specs=[
            pl.BlockSpec((tb, state_dim), lambda i: (i, 0)),          # streamed
            pl.BlockSpec((state_dim, hidden_dim), lambda i: (0, 0)),  # resident
            pl.BlockSpec((1, hidden_dim), lambda i: (0, 0)),
            pl.BlockSpec((hidden_dim, hidden_dim), lambda i: (0, 0)),
            pl.BlockSpec((1, hidden_dim), lambda i: (0, 0)),
            pl.BlockSpec((hidden_dim, action_dim), lambda i: (0, 0)),
            pl.BlockSpec((1, action_dim), lambda i: (0, 0)),
        ],
        out_specs=pl.BlockSpec((tb, action_dim), lambda i: (i, 0)),
        compiler_params=pltpu.CompilerParams(
            dimension_semantics=("parallel",)),
        cost_estimate=cost,
    )(states, w1, b1, w2, b2, w3, b3)

    return out


def init_policy_params(key, state_dim, action_dim, hidden_dim=128):
    """Deterministic synthetic parameter init (uniform, PyTorch-Linear-like bounds)."""
    ks = jax.random.split(key, 6)

    def linear(kw, kb, fan_in, fan_out):
        bound = 1.0 / jnp.sqrt(fan_in)
        w = jax.random.uniform(kw, (fan_in, fan_out), jnp.float32, -bound, bound)
        b = jax.random.uniform(kb, (1, fan_out), jnp.float32, -bound, bound)
        return w, b

    w1, b1 = linear(ks[0], ks[1], state_dim, hidden_dim)
    w2, b2 = linear(ks[2], ks[3], hidden_dim, hidden_dim)
    w3, b3 = linear(ks[4], ks[5], hidden_dim, action_dim)
    return {"w1": w1, "b1": b1, "w2": w2, "b2": b2, "w3": w3, "b3": b3}


def _reference_forward(states, p):
    h1 = jnp.maximum(states @ p["w1"] + p["b1"], 0.0)
    h2 = jnp.maximum(h1 @ p["w2"] + p["b2"], 0.0)
    return h2 @ p["w3"] + p["b3"]


# TODO(synk): get_action's Categorical sampling / log_prob path is host-side
# glue in the PyTorch module; only the forward() pass is implemented here.

if __name__ == "__main__":
    key = jax.random.PRNGKey(0)
    k_param, k_state, k_big = jax.random.split(key, 3)

    B, STATE_DIM, ACTION_DIM, HIDDEN_DIM = 8, 16, 8, 128

    params = init_policy_params(k_param, STATE_DIM, ACTION_DIM, HIDDEN_DIM)
    states = jax.random.normal(k_state, (B, STATE_DIM), dtype=jnp.float32)

    # Small-batch f32 check (single grid step, unpadded narrow output).
    logits = jax.block_until_ready(policy_network_forward(states, params))
    ref = _reference_forward(states, params)
    assert logits.shape == (B, ACTION_DIM)
    assert jnp.allclose(logits, ref, atol=1e-5, rtol=1e-5), "f32 mismatch vs reference"

    # Multi-tile f32 check: non-multiple batch exercises the partial tail block
    # and a multi-step parallel grid (small batch_tile forced for coverage).
    B_big = 300
    states_big = jax.random.normal(k_big, (B_big, STATE_DIM), dtype=jnp.float32)
    logits_big = jax.block_until_ready(
        policy_network_forward(states_big, params, batch_tile=128))
    ref_big = _reference_forward(states_big, params)
    assert logits_big.shape == (B_big, ACTION_DIM)
    assert jnp.allclose(logits_big, ref_big, atol=1e-5, rtol=1e-5), \
        "tiled f32 mismatch vs reference"

    # v7x-style two-core split (balanced tiles, even step count).
    logits_2c = jax.block_until_ready(
        policy_network_forward(states_big, params, num_cores=2))
    assert jnp.allclose(logits_2c, ref_big, atol=1e-5, rtol=1e-5), \
        "num_cores=2 mismatch vs reference"

    # bf16 fast path (all generations): in-kernel input cast, f32 accumulation,
    # looser tolerance since the states themselves are rounded to bf16.
    logits_bf16 = jax.block_until_ready(
        policy_network_forward(states, params, compute_dtype=jnp.bfloat16))
    assert jnp.allclose(logits_bf16, ref, atol=5e-2, rtol=5e-2), \
        "bf16 mismatch vs reference"

    print("KERNEL_OK")
</pallas_src>

<mosaic_0001>
module attributes {stable_mosaic.version = 11 : i64} {
  func.func @_policy_mlp_kernel(%arg0: i32, %arg1: memref<8x16xf32, #tpu.memory_space<vmem>>, %arg2: memref<16x128xf32, #tpu.memory_space<vmem>>, %arg3: memref<1x128xf32, #tpu.memory_space<vmem>>, %arg4: memref<128x128xf32, #tpu.memory_space<vmem>>, %arg5: memref<1x128xf32, #tpu.memory_space<vmem>>, %arg6: memref<128x8xf32, #tpu.memory_space<vmem>>, %arg7: memref<1x8xf32, #tpu.memory_space<vmem>>, %arg8: memref<8x8xf32, #tpu.memory_space<vmem>>) attributes {dimension_semantics = [#tpu.dimension_semantics<parallel>], iteration_bounds = array<i64: 1>, scalar_prefetch = 0 : i64, scratch_operands = 0 : i64, tpu.core_type = #tpu.core_type<tc>, window_params = [{transform_indices = @transform_0, window_bounds = array<i64: 8, 16>}, {pipeline_mode = #tpu.pipeline_mode<synchronous>, transform_indices = @transform_1, window_bounds = array<i64: 16, 128>}, {pipeline_mode = #tpu.pipeline_mode<synchronous>, transform_indices = @transform_2, window_bounds = array<i64: 1, 128>}, {pipeline_mode = #tpu.pipeline_mode<synchronous>, transform_indices = @transform_3, window_bounds = array<i64: 128, 128>}, {pipeline_mode = #tpu.pipeline_mode<synchronous>, transform_indices = @transform_4, window_bounds = array<i64: 1, 128>}, {pipeline_mode = #tpu.pipeline_mode<synchronous>, transform_indices = @transform_5, window_bounds = array<i64: 128, 8>}, {pipeline_mode = #tpu.pipeline_mode<synchronous>, transform_indices = @transform_6, window_bounds = array<i64: 1, 8>}, {transform_indices = @transform_7, window_bounds = array<i64: 8, 8>}]} {
    %c0 = arith.constant 0 : index
    %c0_0 = arith.constant 0 : index
    %0 = vector.load %arg1[%c0, %c0_0] : memref<8x16xf32, #tpu.memory_space<vmem>>, vector<8x16xf32>
    %c0_1 = arith.constant 0 : index
    %c0_2 = arith.constant 0 : index
    %1 = vector.load %arg2[%c0_1, %c0_2] : memref<16x128xf32, #tpu.memory_space<vmem>>, vector<16x128xf32>
    %cst = arith.constant dense<0.000000e+00> : vector<8x128xf32>
    %2 = tpu.matmul %0, %1, %cst {dimension_numbers = #tpu.dot_dimension_numbers<[1], [0], [0], [1], [0, 0, 1, 1], [], []>} : vector<8x16xf32>, vector<16x128xf32>, vector<8x128xf32> -> vector<8x128xf32>
    %c0_3 = arith.constant 0 : index
    %c0_4 = arith.constant 0 : index
    %3 = vector.load %arg3[%c0_3, %c0_4] : memref<1x128xf32, #tpu.memory_space<vmem>>, vector<1x128xf32>
    %4 = vector.broadcast %3 : vector<1x128xf32> to vector<8x128xf32>
    %5 = arith.addf %2, %4 : vector<8x128xf32>
    %cst_5 = arith.constant 0.000000e+00 : f32
    %6 = vector.broadcast %cst_5 : f32 to vector<8x128xf32>
    %7 = arith.maximumf %5, %6 : vector<8x128xf32>
    %c0_6 = arith.constant 0 : index
    %c0_7 = arith.constant 0 : index
    %8 = vector.load %arg4[%c0_6, %c0_7] : memref<128x128xf32, #tpu.memory_space<vmem>>, vector<128x128xf32>
    %cst_8 = arith.constant dense<0.000000e+00> : vector<8x128xf32>
    %9 = tpu.matmul %7, %8, %cst_8 {dimension_numbers = #tpu.dot_dimension_numbers<[1], [0], [0], [1], [0, 0, 1, 1], [], []>} : vector<8x128xf32>, vector<128x128xf32>, vector<8x128xf32> -> vector<8x128xf32>
    %c0_9 = arith.constant 0 : index
    %c0_10 = arith.constant 0 : index
    %10 = vector.load %arg5[%c0_9, %c0_10] : memref<1x128xf32, #tpu.memory_space<vmem>>, vector<1x128xf32>
    %11 = vector.broadcast %10 : vector<1x128xf32> to vector<8x128xf32>
    %12 = arith.addf %9, %11 : vector<8x128xf32>
    %cst_11 = arith.constant 0.000000e+00 : f32
    %13 = vector.broadcast %cst_11 : f32 to vector<8x128xf32>
    %14 = arith.maximumf %12, %13 : vector<8x128xf32>
    %c0_12 = arith.constant 0 : index
    %c0_13 = arith.constant 0 : index
    %15 = vector.load %arg6[%c0_12, %c0_13] : memref<128x8xf32, #tpu.memory_space<vmem>>, vector<128x8xf32>
    %cst_14 = arith.constant dense<0.000000e+00> : vector<8x8xf32>
    %16 = tpu.matmul %14, %15, %cst_14 {dimension_numbers = #tpu.dot_dimension_numbers<[1], [0], [0], [1], [0, 0, 1, 1], [], []>} : vector<8x128xf32>, vector<128x8xf32>, vector<8x8xf32> -> vector<8x8xf32>
    %c0_15 = arith.constant 0 : index
    %c0_16 = arith.constant 0 : index
    %17 = vector.load %arg7[%c0_15, %c0_16] : memref<1x8xf32, #tpu.memory_space<vmem>>, vector<1x8xf32>
    %18 = vector.broadcast %17 : vector<1x8xf32> to vector<8x8xf32>
    %19 = arith.addf %16, %18 : vector<8x8xf32>
    %c0_17 = arith.constant 0 : index
    %c0_18 = arith.constant 0 : index
    %20 = vector.load %arg8[%c0_17, %c0_18] : memref<8x8xf32, #tpu.memory_space<vmem>>, vector<8x8xf32>
    tpu.vector_store %arg8[%c0_17, %c0_18], %19 {strides = array<i32>} : memref<8x8xf32, #tpu.memory_space<vmem>>, vector<8x8xf32>,
    return
  }
  func.func @transform_0(%arg0: i32) -> (i32, i32) {
    %c0_i32 = arith.constant 0 : i32
    %c0_i32_0 = arith.constant 0 : i32
    return %arg0, %c0_i32 : i32, i32
  }
  func.func @transform_1(%arg0: i32) -> (i32, i32) {
    %c0_i32 = arith.constant 0 : i32
    %c0_i32_0 = arith.constant 0 : i32
    %c0_i32_1 = arith.constant 0 : i32
    return %c0_i32, %c0_i32_0 : i32, i32
  }
  func.func @transform_2(%arg0: i32) -> (i32, i32) {
    %c0_i32 = arith.constant 0 : i32
    %c0_i32_0 = arith.constant 0 : i32
    %c0_i32_1 = arith.constant 0 : i32
    return %c0_i32, %c0_i32_0 : i32, i32
  }
  func.func @transform_3(%arg0: i32) -> (i32, i32) {
    %c0_i32 = arith.constant 0 : i32
    %c0_i32_0 = arith.constant 0 : i32
    %c0_i32_1 = arith.constant 0 : i32
    return %c0_i32, %c0_i32_0 : i32, i32
  }
  func.func @transform_4(%arg0: i32) -> (i32, i32) {
    %c0_i32 = arith.constant 0 : i32
    %c0_i32_0 = arith.constant 0 : i32
    %c0_i32_1 = arith.constant 0 : i32
    return %c0_i32, %c0_i32_0 : i32, i32
  }
  func.func @transform_5(%arg0: i32) -> (i32, i32) {
    %c0_i32 = arith.constant 0 : i32
    %c0_i32_0 = arith.constant 0 : i32
    %c0_i32_1 = arith.constant 0 : i32
    return %c0_i32, %c0_i32_0 : i32, i32
  }
  func.func @transform_6(%arg0: i32) -> (i32, i32) {
    %c0_i32 = arith.constant 0 : i32
    %c0_i32_0 = arith.constant 0 : i32
    %c0_i32_1 = arith.constant 0 : i32
    return %c0_i32, %c0_i32_0 : i32, i32
  }
  func.func @transform_7(%arg0: i32) -> (i32, i32) {
    %c0_i32 = arith.constant 0 : i32
    %c0_i32_0 = arith.constant 0 : i32
    return %arg0, %c0_i32 : i32, i32
  }
}

</mosaic_0001>

<bundles_post_ra>
// kernel: policy_network_forward.1
= control target key start
LH: loop header
LB: loop body
LE: loop exit
PB: predicated region body
PF: predicated region fallthrough
CT: control target
= control target key end

     0   :  { %12 = vsyncpa [#allocation3], 0  ;;  %s393_s0 = inlined_call_operand.vmem [shape: f32[8,16], index: 0, kind: input, shape index: {}]   ;;  %s394_s1 = inlined_call_operand.hbm [shape: f32[16,128], index: 1, kind: input, shape index: {}]   ;;  %s395_s2 = inlined_call_operand.vmem [shape: f32[1,128], index: 2, kind: input, shape index: {}]   ;;  %s396_s3 = inlined_call_operand.vmem [shape: f32[128,128], index: 3, kind: input, shape index: {}]   ;;  %s397_s4 = inlined_call_operand.vmem [shape: f32[1,128], index: 4, kind: input, shape index: {}]   ;;  %s398_s5 = inlined_call_operand.vmem [shape: f32[128,8], index: 5, kind: input, shape index: {}]   ;;  %s399_s6 = inlined_call_operand.vmem [shape: f32[1,8], index: 6, kind: input, shape index: {}]   ;;  %s400_s7 = inlined_call_operand.hbm [shape: f32[8,8], index: 7, kind: output, shape index: {}]  }
   0x1   :  { %13 = vsyncpa [#allocation4], 0  ;;  %s20_s26 = sshll.u32 %s394_s1, 4  ;;  %s235_s27 = smov [#allocation2]   ;;  %s21_s26 = int_to_ptr.hbm [resolvable:$true] %s20_s26 }
   0x2   :  { %s22_s28 = sshll.u32 %s235_s27, 4  ;;  %s236_s29 = smov 128   ;;  %s23_s28 = int_to_ptr.vmem [resolvable:$true] %s22_s28 }
   0x3   :  { %s237_s30 = smov 8  }
   0x4   :  { %28 = dma.hbm_to_vmem [thread:$0]  %s21_s26, 256, %s23_s28, [#allocation3], %s236_s29, %s236_s29, %s237_s30  }
   0x5   :  { %231 = dma.done.wait [#allocation3], 256  }
   0x6   :  { %232 = vsyncadd [#allocation3], 4294967040  ;;  %v45_v0 = vld [vmem:[#allocation2 + $0x8] sm:$0xff]  ;;  %v44_v1 = vld [vmem:[#allocation2] sm:$0xff]  ;;  %vm50_vm0 = vcmask 130048   ;;  %s238_s25 = smov [#allocation5]  }
   0x7   :  { %68 = vmatpush.msra.mxu0 %v45_v0  ;;  %v43_v2 = vld [vmem:[%s393_s0] sm:$0xff]  ;;  %v90_v3 = vld [vmem:[%s396_s3 + $0x78] sm:$0xff]  ;;  %v89_v4 = vld [vmem:[%s396_s3 + $0x70] sm:$0xff]  ;;  %s163_s26 = sshll.u32 %s238_s25, 4  ;;  %s165_s29 = sshll.u32 %s400_s7, 4  ;;  %vm156_vm1 = vcmask 64512   ;;  %s164_s26 = int_to_ptr.vmem [resolvable:$true] %s163_s26  ;;  %s166_s29 = int_to_ptr.hbm [resolvable:$true] %s165_s29 }
   0x8   :  { %95 = vmatpush.msra.mxu1 %v90_v3  ;;  %v88_v5 = vld [vmem:[%s396_s3 + $0x68] sm:$0xff]  ;;  %v87_v6 = vld [vmem:[%s396_s3 + $0x60] sm:$0xff]  ;;  %v86_v7 = vld [vmem:[%s396_s3 + $0x58] sm:$0xff] }
   0x9   :  { %69 = vmatpush.msra.mxu0 %v44_v1  ;;  %v85_v8 = vld [vmem:[%s396_s3 + $0x50] sm:$0xff]  ;;  %v84_v9 = vld [vmem:[%s396_s3 + $0x48] sm:$0xff]  ;;  %v83_v10 = vld [vmem:[%s396_s3 + $0x40] sm:$0xff] }
   0xa   :  { %175 = vmatmul.msk.f32.vlgmr.msra.gmra.mxu0 %vm50_vm0, %v43_v2  ;;  %96 = vmatpush.msra.mxu1 %v89_v4  ;;  %v82_v11 = vld [vmem:[%s396_s3 + $0x38] sm:$0xff]  ;;  %v81_v12 = vld [vmem:[%s396_s3 + $0x30] sm:$0xff]  ;;  %v80_v13 = vld [vmem:[%s396_s3 + $0x28] sm:$0xff] }
   0xb   :  { %v79_v14 = vld [vmem:[%s396_s3 + $0x20] sm:$0xff]  ;;  %v78_v15 = vld [vmem:[%s396_s3 + $0x18] sm:$0xff]  ;;  %v77_v16 = vld [vmem:[%s396_s3 + $0x10] sm:$0xff] }
   0xc   :  { %97 = vmatpush.msra.mxu1 %v88_v5  ;;  %v76_v17 = vld [vmem:[%s396_s3 + $0x8] sm:$0xff]  ;;  %v75_v18 = vld [vmem:[%s396_s3] sm:$0xff]  ;;  %v131_v19 = vld [vmem:[%s398_s5 + $0x78] sm:$0xff] }
   0xd   :  { %v130_v20 = vld [vmem:[%s398_s5 + $0x70] sm:$0xff]  ;;  %136 = vmatpush.msra.mxu2 %v131_v19  ;;  %v129_v21 = vld [vmem:[%s398_s5 + $0x68] sm:$0xff]  ;;  %v128_v22 = vld [vmem:[%s398_s5 + $0x60] sm:$0xff] }
   0xe   :  { %98 = vmatpush.msra.mxu1 %v87_v6  ;;  %v127_v23 = vld [vmem:[%s398_s5 + $0x58] sm:$0xff]  ;;  %v126_v24 = vld [vmem:[%s398_s5 + $0x50] sm:$0xff]  ;;  %v125_v25 = vld [vmem:[%s398_s5 + $0x48] sm:$0xff] }
   0xf   :  { %137 = vmatpush.msra.mxu2 %v130_v20  ;;  %v124_v26 = vld [vmem:[%s398_s5 + $0x40] sm:$0xff]  ;;  %v123_v27 = vld [vmem:[%s398_s5 + $0x38] sm:$0xff]  ;;  %v122_v28 = vld [vmem:[%s398_s5 + $0x30] sm:$0xff] }
  0x10   :  { %99 = vmatpush.msra.mxu1 %v86_v7  ;;  %v121_v29 = vld [vmem:[%s398_s5 + $0x28] sm:$0xff]  ;;  %v120_v30 = vld [vmem:[%s398_s5 + $0x20] sm:$0xff]  ;;  %v119_v31 = vld [vmem:[%s398_s5 + $0x18] sm:$0xff] }
  0x11   :  { %138 = vmatpush.msra.mxu2 %v129_v21  ;;  %v180_v32 = vld [vmem:[%s395_s2] ss:$0 sm:$0xff]  ;;  %v118_v36 = vld [vmem:[%s398_s5 + $0x10] sm:$0xff]  ;;  %v117_v37 = vld [vmem:[%s398_s5 + $0x8] sm:$0xff] }
  0x12   :  { %100 = vmatpush.msra.mxu1 %v85_v8  ;;  %v116_v38 = vld [vmem:[%s398_s5] sm:$0xff] }
  0x13   :  { %139 = vmatpush.msra.mxu2 %v128_v22  ;;  %v181_v39 = vld [vmem:[%s397_s4] ss:$0 sm:$0xff] }
  0x14   :  { %101 = vmatpush.msra.mxu1 %v84_v9  ;;  %v182_v43 = vld [vmem:[%s399_s6] ss:$0 sm:$0xff] }
  0x15   :  { %140 = vmatpush.msra.mxu2 %v127_v23 }
  0x16   :  { %102 = vmatpush.msra.mxu1 %v83_v10 }
  0x17   :  { %141 = vmatpush.msra.mxu2 %v126_v24 }
  0x18   :  { %103 = vmatpush.msra.mxu1 %v82_v11 }
  0x19   :  { %142 = vmatpush.msra.mxu2 %v125_v25 }
  0x1a   :  { %104 = vmatpush.msra.mxu1 %v81_v12 }
  0x1b   :  { %143 = vmatpush.msra.mxu2 %v124_v26 }
  0x1c   :  { %105 = vmatpush.msra.mxu1 %v80_v13 }
  0x1d   :  { %144 = vmatpush.msra.mxu2 %v123_v27 }
  0x1e   :  { %106 = vmatpush.msra.mxu1 %v79_v14 }
  0x1f   :  { %145 = vmatpush.msra.mxu2 %v122_v28 }
  0x20   :  { %107 = vmatpush.msra.mxu1 %v78_v15 }
  0x21   :  { %146 = vmatpush.msra.mxu2 %v121_v29 }
  0x22   :  { %108 = vmatpush.msra.mxu1 %v77_v16 }
  0x23   :  { %147 = vmatpush.msra.mxu2 %v120_v30 }
  0x24   :  { %109 = vmatpush.msra.mxu1 %v76_v17 }
  0x25   :  { %148 = vmatpush.msra.mxu2 %v119_v31 }
  0x26   :  { %110 = vmatpush.msra.mxu1 %v75_v18 }
  0x27   :  { %149 = vmatpush.msra.mxu2 %v118_v36 }
  0x29   :  { %150 = vmatpush.msra.mxu2 %v117_v37 }
  0x2b   :  { %151 = vmatpush.msra.mxu2 %v116_v38 }
  0x87   :  { %v71_v33 = vpop.f32.mrf.mxu0 }
  0x88   :  { %v72_v34 = vadd.f32 %v180_v32, %v71_v33 }
  0x8a   :  { %v74_v35 = vmax.f32 %v72_v34, 0.0 }
  0x8c   :  { %111 = vmatmul.f32.vlgmr.msra.gmra.mxu1 %v74_v35 }
 0x109   :  { %v112_v40 = vpop.f32.mrf.mxu1 }
 0x10a   :  { %v113_v41 = vadd.f32 %v181_v39, %v112_v40 }
 0x10c   :  { %v115_v42 = vmax.f32 %v113_v41, 0.0 }
 0x10e   :  { %152 = vmatmul.f32.vlgmr.msra.gmra.mxu2 %v115_v42 }
 0x191   :  { %v153_v44 = vpop.f32.mrf.mxu2 }
 0x192   :  { %v154_v45 = vadd.f32 %v182_v43, %v153_v44 }
 0x194   :  { %157 = vst.msk [vmem:[#allocation5] sm:$0xff] %vm156_vm1, %v154_v45 }
 0x195   :  { %168 = dma.vmem_to_hbm [thread:$0]  %s164_s26, 128, %s166_s29, [#allocation4]  }
 0x196   :  { %233 = dma.done.wait [#allocation4], 128  }
 0x197   :  { %234 = vsyncadd [#allocation4], 4294967168 }
 0x198   :  { %173 = vsyncpa [#allocation3], 1 }
 0x199   :  { %174 = vsyncpa [#allocation4], 1 }

</bundles_post_ra>
